<compile_context>
chip_gen: v6e
topology: v6e:2x2x1
jax: 0.10.0
libtpu: 0.0.40
codegen_flags: <defaults>
</compile_context>

<pallas_src>
import jax
import jax.numpy as jnp
from jax.experimental import pallas as pl
from jax.experimental.pallas import tpu as pltpu

FEAT = 10
BATCH = 10  # must equal FEAT for the (B,10)+(10,10) broadcast in the spec


def graph_break_module_kernel(x_ref, mats_ref, rows_ref, o_ref):
    # x_ref:    (BATCH, FEAT)
    # mats_ref: (5, FEAT, FEAT) = [W1, W2, W_l3_1, W_l4_2, W_l5_0]  (PyTorch (out,in) layout)
    # rows_ref: (5, FEAT)       = [b1, b2, s1, s2, s_top]
    x = x_ref[...]

    w1 = mats_ref[0]
    w2 = mats_ref[1]
    c = mats_ref[2] + mats_ref[3] + mats_ref[4]      # W_l3_1 + W_l4_2 + W_l5_0 (free VPU filler)

    b1 = rows_ref[0:1, :]
    b2 = rows_ref[1:2, :]
    s1 = rows_ref[2:3, :]
    s2 = rows_ref[3:4, :]
    s_top = rows_ref[4:5, :]

    # layer1: relu(x @ W1^T + b1) * s1
    h1 = jnp.maximum(
        jnp.dot(x, w1.T, preferred_element_type=jnp.float32) + b1, 0.0) * s1
    # layer2: relu(h1 @ W2^T + b2) * s2
    h2 = jnp.maximum(
        jnp.dot(h1, w2.T, preferred_element_type=jnp.float32) + b2, 0.0) * s2
    # top: (h2 + sum of three weights) * s_top
    o_ref[...] = ((h2 + c) * s_top).astype(o_ref.dtype)


def module_forward(x, w1, b1, s1, w2, b2, s2, w3_1, w4_2, w5_0, s_top):
    """Forward of ModuleForwardHasGraphBreak.

    x: (10, 10); w*: (10, 10) PyTorch-layout (out, in); b*: (10,);
    s1/s2/s_top: (1, 10).
    """
    # Only two wrapper-side ops: pack operands to minimize per-call DMA count.
    mats = jnp.stack([w1, w2, w3_1, w4_2, w5_0], axis=0)          # (5, 10, 10)
    rows = jnp.concatenate(
        [b1.reshape(1, FEAT), b2.reshape(1, FEAT),
         s1.reshape(1, FEAT), s2.reshape(1, FEAT),
         s_top.reshape(1, FEAT)], axis=0)                         # (5, 10)

    vmem = pl.BlockSpec(memory_space=pltpu.MemorySpace.VMEM)
    return pl.pallas_call(
        graph_break_module_kernel,
        out_shape=jax.ShapeDtypeStruct((BATCH, FEAT), x.dtype),
        in_specs=[vmem, vmem, vmem],
        out_specs=vmem,
    )(x, mats, rows)


def reference(x, w1, b1, s1, w2, b2, s2, w3_1, w4_2, w5_0, s_top):
    """Unfused pure-JAX reference matching the PyTorch module exactly."""
    h1 = jnp.maximum(x @ w1.T + b1, 0.0) * s1
    h2 = jnp.maximum(h1 @ w2.T + b2, 0.0) * s2
    return (h2 + w3_1 + w4_2 + w5_0) * s_top


if __name__ == "__main__":
    key = jax.random.PRNGKey(0)
    ks = jax.random.split(key, 12)
    bound = 1.0 / (FEAT ** 0.5)

    def lin_w(k):
        return jax.random.uniform(k, (FEAT, FEAT), jnp.float32,
                                  minval=-bound, maxval=bound)

    def lin_b(k):
        return jax.random.uniform(k, (FEAT,), jnp.float32,
                                  minval=-bound, maxval=bound)

    # layer1 / layer2 (BasicModule): Linear(10,10) + randn scale (1,10)
    w1, b1 = lin_w(ks[0]), lin_b(ks[1])
    s1 = jax.random.normal(ks[2], (1, FEAT), jnp.float32)
    w2, b2 = lin_w(ks[3]), lin_b(ks[4])
    s2 = jax.random.normal(ks[5], (1, FEAT), jnp.float32)

    # Weights looked up after the graph break:
    w3_1 = lin_w(ks[6])   # layer3[1].linear1.weight
    w4_2 = lin_w(ks[7])   # layer4[2].weight
    w5_0 = lin_w(ks[8])   # layer5['0'].weight

    # top-level scale
    s_top = jax.random.normal(ks[9], (1, FEAT), jnp.float32)

    x = jax.random.normal(ks[10], (BATCH, FEAT), jnp.float32)

    out = jax.block_until_ready(
        module_forward(x, w1, b1, s1, w2, b2, s2, w3_1, w4_2, w5_0, s_top))

    ref = reference(x, w1, b1, s1, w2, b2, s2, w3_1, w4_2, w5_0, s_top)
    assert out.shape == (BATCH, FEAT) and out.dtype == jnp.float32
    assert jnp.allclose(out, ref, rtol=1e-5, atol=1e-5), "mismatch vs reference"

    print("KERNEL_OK")
</pallas_src>

<mosaic_0001>
module attributes {stable_mosaic.version = 11 : i64} {
  func.func @graph_break_module_kernel(%arg0: memref<10x10xf32, #tpu.memory_space<vmem>>, %arg1: memref<5x10x10xf32, #tpu.memory_space<vmem>>, %arg2: memref<5x10xf32, #tpu.memory_space<vmem>>, %arg3: memref<10x10xf32, #tpu.memory_space<vmem>>) attributes {dimension_semantics = [], scalar_prefetch = 0 : i64, scratch_operands = 0 : i64, tpu.core_type = #tpu.core_type<tc>} {
    %c0 = arith.constant 0 : index
    %c0_0 = arith.constant 0 : index
    %0 = vector.load %arg0[%c0, %c0_0] : memref<10x10xf32, #tpu.memory_space<vmem>>, vector<10x10xf32>
    %c0_1 = arith.constant 0 : index
    %c0_2 = arith.constant 0 : index
    %c0_3 = arith.constant 0 : index
    %1 = vector.load %arg1[%c0_1, %c0_2, %c0_3] : memref<5x10x10xf32, #tpu.memory_space<vmem>>, vector<1x10x10xf32>
    %2 = vector.shape_cast %1 : vector<1x10x10xf32> to vector<10x10xf32>
    %c1 = arith.constant 1 : index
    %c0_4 = arith.constant 0 : index
    %c0_5 = arith.constant 0 : index
    %3 = vector.load %arg1[%c1, %c0_4, %c0_5] : memref<5x10x10xf32, #tpu.memory_space<vmem>>, vector<1x10x10xf32>
    %4 = vector.shape_cast %3 : vector<1x10x10xf32> to vector<10x10xf32>
    %c2 = arith.constant 2 : index
    %c0_6 = arith.constant 0 : index
    %c0_7 = arith.constant 0 : index
    %5 = vector.load %arg1[%c2, %c0_6, %c0_7] : memref<5x10x10xf32, #tpu.memory_space<vmem>>, vector<1x10x10xf32>
    %6 = vector.shape_cast %5 : vector<1x10x10xf32> to vector<10x10xf32>
    %c3 = arith.constant 3 : index
    %c0_8 = arith.constant 0 : index
    %c0_9 = arith.constant 0 : index
    %7 = vector.load %arg1[%c3, %c0_8, %c0_9] : memref<5x10x10xf32, #tpu.memory_space<vmem>>, vector<1x10x10xf32>
    %8 = vector.shape_cast %7 : vector<1x10x10xf32> to vector<10x10xf32>
    %9 = arith.addf %6, %8 : vector<10x10xf32>
    %c4 = arith.constant 4 : index
    %c0_10 = arith.constant 0 : index
    %c0_11 = arith.constant 0 : index
    %10 = vector.load %arg1[%c4, %c0_10, %c0_11] : memref<5x10x10xf32, #tpu.memory_space<vmem>>, vector<1x10x10xf32>
    %11 = vector.shape_cast %10 : vector<1x10x10xf32> to vector<10x10xf32>
    %12 = arith.addf %9, %11 : vector<10x10xf32>
    %c0_12 = arith.constant 0 : index
    %c0_13 = arith.constant 0 : index
    %13 = vector.load %arg2[%c0_12, %c0_13] : memref<5x10xf32, #tpu.memory_space<vmem>>, vector<1x10xf32>
    %c1_14 = arith.constant 1 : index
    %c0_15 = arith.constant 0 : index
    %14 = vector.load %arg2[%c1_14, %c0_15] : memref<5x10xf32, #tpu.memory_space<vmem>>, vector<1x10xf32>
    %c2_16 = arith.constant 2 : index
    %c0_17 = arith.constant 0 : index
    %15 = vector.load %arg2[%c2_16, %c0_17] : memref<5x10xf32, #tpu.memory_space<vmem>>, vector<1x10xf32>
    %c3_18 = arith.constant 3 : index
    %c0_19 = arith.constant 0 : index
    %16 = vector.load %arg2[%c3_18, %c0_19] : memref<5x10xf32, #tpu.memory_space<vmem>>, vector<1x10xf32>
    %c4_20 = arith.constant 4 : index
    %c0_21 = arith.constant 0 : index
    %17 = vector.load %arg2[%c4_20, %c0_21] : memref<5x10xf32, #tpu.memory_space<vmem>>, vector<1x10xf32>
    %18 = tpu.transpose %2, [1, 0] : vector<10x10xf32> -> vector<10x10xf32>
    %cst = arith.constant dense<0.000000e+00> : vector<10x10xf32>
    %19 = tpu.matmul %0, %18, %cst {dimension_numbers = #tpu.dot_dimension_numbers<[1], [0], [0], [1], [0, 0, 1, 1], [], []>} : vector<10x10xf32>, vector<10x10xf32>, vector<10x10xf32> -> vector<10x10xf32>
    %20 = vector.broadcast %13 : vector<1x10xf32> to vector<10x10xf32>
    %21 = arith.addf %19, %20 : vector<10x10xf32>
    %cst_22 = arith.constant 0.000000e+00 : f32
    %22 = vector.broadcast %cst_22 : f32 to vector<10x10xf32>
    %23 = arith.maximumf %21, %22 : vector<10x10xf32>
    %24 = vector.broadcast %15 : vector<1x10xf32> to vector<10x10xf32>
    %25 = arith.mulf %23, %24 : vector<10x10xf32>
    %26 = tpu.transpose %4, [1, 0] : vector<10x10xf32> -> vector<10x10xf32>
    %cst_23 = arith.constant dense<0.000000e+00> : vector<10x10xf32>
    %27 = tpu.matmul %25, %26, %cst_23 {dimension_numbers = #tpu.dot_dimension_numbers<[1], [0], [0], [1], [0, 0, 1, 1], [], []>} : vector<10x10xf32>, vector<10x10xf32>, vector<10x10xf32> -> vector<10x10xf32>
    %28 = vector.broadcast %14 : vector<1x10xf32> to vector<10x10xf32>
    %29 = arith.addf %27, %28 : vector<10x10xf32>
    %cst_24 = arith.constant 0.000000e+00 : f32
    %30 = vector.broadcast %cst_24 : f32 to vector<10x10xf32>
    %31 = arith.maximumf %29, %30 : vector<10x10xf32>
    %32 = vector.broadcast %16 : vector<1x10xf32> to vector<10x10xf32>
    %33 = arith.mulf %31, %32 : vector<10x10xf32>
    %34 = arith.addf %33, %12 : vector<10x10xf32>
    %35 = vector.broadcast %17 : vector<1x10xf32> to vector<10x10xf32>
    %36 = arith.mulf %34, %35 : vector<10x10xf32>
    %c0_25 = arith.constant 0 : index
    %c0_26 = arith.constant 0 : index
    %37 = vector.load %arg3[%c0_25, %c0_26] : memref<10x10xf32, #tpu.memory_space<vmem>>, vector<10x10xf32>
    tpu.vector_store %arg3[%c0_25, %c0_26], %36 {strides = array<i32>} : memref<10x10xf32, #tpu.memory_space<vmem>>, vector<10x10xf32>,
    return
  }
}

</mosaic_0001>

<bundles_post_ra>
// kernel: tpu_custom_call.1
= control target key start
LH: loop header
LB: loop body
LE: loop exit
PB: predicated region body
PF: predicated region fallthrough
CT: control target
= control target key end

     0   :  { %8 = vsyncpa [#allocation3], 0  ;;  %s494_s0 = inlined_call_operand.hbm [shape: f32[10,10], index: 0, kind: input, shape index: {}]   ;;  %s495_s1 = inlined_call_operand.hbm [shape: f32[5,10,10], index: 1, kind: input, shape index: {}]   ;;  %s496_s2 = inlined_call_operand.hbm [shape: f32[5,10], index: 2, kind: input, shape index: {}]   ;;  %s497_s3 = inlined_call_operand.hbm [shape: f32[10,10], index: 3, kind: output, shape index: {}]  }
   0x1   :  { %9 = vsyncpa [#allocation6], 0 }
   0x2   :  { %10 = vsyncpa [#allocation4], 0  ;;  %s434_s12 = smov [#allocation5]   ;;  %s435_s14 = smov [#allocation2]  }
   0x3   :  { %s28_s13 = sshll.u32 %s434_s12, 4  ;;  %s16_s15 = sshll.u32 %s435_s14, 4  ;;  %s29_s13 = int_to_ptr.vmem [resolvable:$true] %s28_s13  ;;  %s17_s15 = int_to_ptr.vmem [resolvable:$true] %s16_s15 }
   0x4   :  { %s356_s16 = scalar_lea.vmem %s29_s13, 1280  ;;  %p361_p1 = scmp.lt.s32.totalorder %s29_s13, %s29_s13 }
   0x5   :  { %p357_p0 = scmp.ne.s32.totalorder %s29_s13, %s356_s16  ;;  %p362_p2 = scmp.lt.s32.totalorder %s356_s16, %s356_s16 }
   0x7   :  { %p363_p3 = por %p362_p2, %p361_p1 }
   0x9   :  { %p364_p4 = pnand %p363_p3, %p357_p0 }
   0xb   :  { %367 = shalt.err (!%p364_p4)
}
   0xc   :  { %s436_s17 = smov 128   ;;  %s437_s18 = smov 8  }
   0xd   :  { %34 = dma.hbm_to_vmem [thread:$0]  %s495_s1, 1280, %s29_s13, [#allocation6], %s436_s17, %s436_s17, %s437_s18  }
   0xe   :  { %s376_s21 = scalar_lea.vmem %s17_s15, 256  ;;  %p381_p6 = scmp.lt.s32.totalorder %s17_s15, %s17_s15 }
   0xf   :  { %p377_p5 = scmp.ne.s32.totalorder %s17_s15, %s376_s21  ;;  %p382_p7 = scmp.lt.s32.totalorder %s376_s21, %s376_s21 }
  0x11   :  { %p383_p8 = por %p382_p7, %p381_p6 }
  0x13   :  { %p384_p9 = pnand %p383_p8, %p377_p5 }
  0x15   :  { %387 = shalt.err (!%p384_p9)
}
  0x16   :  { %22 = dma.hbm_to_vmem [thread:$0]  %s494_s0, 256, %s17_s15, [#allocation3], %s436_s17, %s436_s17, %s437_s18  }
  0x17   :  { %s438_s24 = smov [#allocation7]  }
  0x18   :  { %s41_s25 = sshll.u32 %s438_s24, 4  ;;  %s42_s25 = int_to_ptr.vmem [resolvable:$true] %s41_s25 }
  0x19   :  { %s396_s26 = scalar_lea.vmem %s42_s25, 128  ;;  %p401_p11 = scmp.lt.s32.totalorder %s42_s25, %s42_s25 }
  0x1a   :  { %p397_p10 = scmp.ne.s32.totalorder %s42_s25, %s396_s26  ;;  %p402_p12 = scmp.lt.s32.totalorder %s396_s26, %s396_s26 }
  0x1c   :  { %p403_p13 = por %p402_p12, %p401_p11 }
  0x1e   :  { %p404_p0 = pnand %p403_p13, %p397_p10 }
  0x20   :  { %407 = shalt.err (!%p404_p0)
}
  0x21   :  { %44 = dma.hbm_to_vmem [thread:$0]  %s496_s2, 128, %s42_s25, [#allocation6]  }
  0x22   :  { %428 = dma.done.wait [#allocation3], 256  }
  0x23   :  { %429 = vsyncadd [#allocation3], 4294967040 }
  0x24   :  { %430 = dma.done.wait [#allocation6], 1408  }
  0x25   :  { %431 = vsyncadd [#allocation6], 4294965888  ;;  %vm83_vm0 = vcmask 80896   ;;  %v57_v0 = vld [vmem:[#allocation5 + $0x8] sm:$0x3]  ;;  %v56_v1 = vld [vmem:[#allocation5] sm:$0xff] }
  0x26   :  { %v54_v2 = vld [vmem:[#allocation2] sm:$0xff]  ;;  %328 = vmatprep.subr.msk.mxu0 %vm83_vm0, %v57_v0  ;;  %v55_v3 = vld [vmem:[#allocation2 + $0x8] sm:$0x3]  ;;  %v63_v16 = vld [vmem:[#allocation5 + $0x28] sm:$0x3]  ;;  %vm287_vm1 = vcmask 74752  }
  0x27   :  { %332 = vmatprep.mubr.msk.f32.mxu0 %vm83_vm0, %v54_v2  ;;  %329 = vmatpush3.xpose.msk.msra.mxu0 %vm83_vm0, %v57_v0  ;;  %v60_v4 = vld [vmem:[#allocation5 + $0x18] sm:$0x3]  ;;  %v59_v5 = vld [vmem:[#allocation5 + $0x10] sm:$0xff]  ;;  %v62_v19 = vld [vmem:[#allocation5 + $0x20] sm:$0xff]  ;;  %s439_s0 = smov [#allocation8]  }
  0x28   :  { %330 = vmatprep.subr.msk.mxu0 %vm83_vm0, %v56_v1  ;;  %335 = vmatprep.subr.msk.mxu1 %vm83_vm0, %v60_v4  ;;  %v307_v6 = vld [vmem:[#allocation7] ss:$0 sm:$0xff]  ;;  %v312_v13 = vld [vmem:[#allocation7 + $0x2] ss:$0 sm:$0xff]  ;;  %v66_v17 = vld [vmem:[#allocation5 + $0x38] sm:$0x3] }
  0x29   :  { %336 = vmatpush3.xpose.msk.msra.mxu1 %vm83_vm0, %v60_v4  ;;  %v313_v18 = vld [vmem:[#allocation7 + $0x1] ss:$0 sm:$0xff]  ;;  %v68_v21 = vadd.f32 %v66_v17, %v63_v16  ;;  %v71_v22 = vld [vmem:[#allocation5 + $0x48] sm:$0x3]  ;;  %v318_v26 = vld [vmem:[#allocation7 + $0x3] ss:$0 sm:$0xff] }
  0x2a   :  { %337 = vmatprep.subr.msk.mxu1 %vm83_vm0, %v59_v5  ;;  %v65_v20 = vld [vmem:[#allocation5 + $0x30] sm:$0xff]  ;;  %v70_v27 = vld [vmem:[#allocation5 + $0x40] sm:$0xff]  ;;  %s294_s2 = sshll.u32 %s439_s0, 4  ;;  %s295_s2 = int_to_ptr.vmem [resolvable:$true] %s294_s2 }
  0x2b   :  { %331 = vmatpush3.xpose.msk.msra.mxu0 %vm83_vm0, %v56_v1  ;;  %v67_v25 = vadd.f32 %v65_v20, %v62_v19  ;;  %v73_v29 = vadd.f32 %v71_v22, %v68_v21  ;;  %v319_v35 = vld [vmem:[#allocation7 + $0x4] ss:$0 sm:$0xff]  ;;  %s408_s28 = scalar_lea.vmem %s295_s2, 256  ;;  %p413_p2 = scmp.lt.s32.totalorder %s295_s2, %s295_s2 }
  0x2c   :  { %p409_p1 = scmp.ne.s32.totalorder %s295_s2, %s408_s28  ;;  %p414_p3 = scmp.lt.s32.totalorder %s408_s28, %s408_s28 }
  0x2d   :  { %338 = vmatpush3.xpose.msk.msra.mxu1 %vm83_vm0, %v59_v5  ;;  %v72_v33 = vadd.f32 %v70_v27, %v67_v25 }
  0x2e   :  { %333 = vmatmul.mubr.msk.f32.vlgmr.msra.gmra.mxu0 %vm83_vm0, %v55_v3  ;;  %p415_p4 = por %p414_p3, %p413_p2 }
  0x30   :  { %p416_p5 = pnand %p415_p4, %p409_p1 }
  0xee   :  { %v334_v7 = vpop.f32.mrf.mxu0 }
  0xef   :  { %v168_v8 = vadd.f32 %v334_v7, %v307_v6 }
  0xf0   :  { %v162_v9 = vpop.f32.mrf.mxu0 }
  0xf1   :  { %v163_v10 = vadd.f32 %v307_v6, %v162_v9  ;;  %v172_v11 = vmax.f32 %v168_v8, 0.0 }
  0xf3   :  { %v171_v12 = vmax.f32 %v163_v10, 0.0  ;;  %v178_v15 = vmul.f32 %v312_v13, %v172_v11 }
  0xf5   :  { %v177_v14 = vmul.f32 %v312_v13, %v171_v12 }
  0xf7   :  { %339 = vmatprep.mubr.msk.f32.mxu1 %vm83_vm0, %v177_v14 }
  0xf8   :  { %340 = vmatmul.mubr.msk.f32.vlgmr.msra.gmra.mxu1 %vm83_vm0, %v178_v15 }
 0x1b8   :  { %v341_v23 = vpop.f32.mrf.mxu1 }
 0x1b9   :  { %v267_v24 = vadd.f32 %v341_v23, %v313_v18 }
 0x1ba   :  { %v261_v28 = vpop.f32.mrf.mxu1 }
 0x1bb   :  { %v271_v30 = vmax.f32 %v267_v24, 0.0  ;;  %v262_v31 = vadd.f32 %v313_v18, %v261_v28 }
 0x1bd   :  { %v277_v32 = vmul.f32 %v318_v26, %v271_v30  ;;  %v270_v34 = vmax.f32 %v262_v31, 0.0 }
 0x1bf   :  { %v279_v36 = vadd.f32 %v277_v32, %v73_v29  ;;  %v276_v37 = vmul.f32 %v318_v26, %v270_v34 }
 0x1c1   :  { %v285_v38 = vmul.f32 %v319_v35, %v279_v36  ;;  %v278_v39 = vadd.f32 %v276_v37, %v72_v33 }
 0x1c3   :  { %v284_v40 = vmul.f32 %v319_v35, %v278_v39  ;;  %288 = vst.msk [vmem:[#allocation8 + $0x8] sm:$0x3] %vm287_vm1, %v285_v38 }
 0x1c5   :  { %286 = vst.msk [vmem:[#allocation8] sm:$0xff] %vm83_vm0, %v284_v40 }
 0x1c6   :  { %419 = shalt.err (!%p416_p5)
}
 0x1c7   :  { %300 = dma.vmem_to_hbm [thread:$0]  %s295_s2, 256, %s497_s3, [#allocation4], %s436_s17, %s436_s17, %s437_s18  }
 0x1c8   :  { %432 = dma.done.wait [#allocation4], 256  }
 0x1c9   :  { %433 = vsyncadd [#allocation4], 4294967040 }
 0x1ca   :  { %304 = vsyncpa [#allocation3], 1 }
 0x1cb   :  { %305 = vsyncpa [#allocation6], 1 }
 0x1cc   :  { %306 = vsyncpa [#allocation4], 1 }

</bundles_post_ra>
